<compile_context>
chip_gen: v5e
topology: v5e:2x2
jax: 0.10.0
libtpu: 0.0.40
codegen_flags: <defaults>
</compile_context>

<pallas_src>
import functools
import math

import jax
import jax.numpy as jnp
from jax import lax
from jax.experimental import pallas as pl
from jax.experimental.pallas import tpu as pltpu


def _round_up(x, m):
    return ((x + m - 1) // m) * m


def create_real_dictionary(T, drr, dtheta):
    """JAX port of creatRealDictionary (tiny parameter-setup glue, stays in JAX)."""
    i = jnp.arange(T, dtype=jnp.float32)[:, None]              # (T, 1)
    sign = jnp.where(jnp.mod(i, 2.0) == 0.0, 1.0, -1.0)        # (-1)**i (integer exponent)
    pow_pos = jnp.power(drr[None, :], i)                       # Drr**i      (Drr > 0)
    pow_neg = sign * pow_pos                                   # (-Drr)**i
    cos_t = jnp.cos(i * dtheta[None, :])
    sin_t = jnp.sin(i * dtheta[None, :])
    W1 = pow_pos * cos_t
    W2 = pow_neg * cos_t
    W3 = pow_pos * sin_t
    W4 = pow_neg * sin_t
    ones = jnp.ones((T, 1), dtype=jnp.float32)
    dic = jnp.concatenate([ones, W1, W2, W3, W4], axis=1)      # (T, 1 + 4N)
    G = jnp.sqrt(jnp.sum(dic * dic, axis=0))                   # column 2-norms
    G = jnp.where(G == 0.0, jnp.sqrt(jnp.float32(T)), G)
    return dic / G


def _fista_kernel(scal_ref, a_ref, dty_ref, out_ref, y_ref, *,
                  max_iter, unroll, thr0_sq, thr_sq, use_bf16_matmul):
    """FISTA hot loop for one column tile.

    scal_ref (SMEM, 1-D): [lam, tt_0, tt_1, ..., tt_{max_iter-1}]
    out_ref doubles as x storage; y_ref is the momentum iterate.
    Early exit: full reduce->scalar check once per `unroll`-step chunk, then an
    exact per-step tail so the total iteration cap equals torch's maxIter.
    """
    A = a_ref[...]                          # (K_pad, K_pad), constant across iterations
    dty = dty_ref[...]                      # (K_pad, TILE_BM), already scaled by 1/L
    lam = scal_ref[0]                       # softshrink threshold = 0.1 / L

    A_mm = A.astype(jnp.bfloat16) if use_bf16_matmul else A

    def softshrink(z):
        # z - clip(z, -lam, lam): 3 VALU ops/elem instead of 2 cmp + 2 select + 2 add
        return z - jnp.clip(z, -lam, lam)

    def step(x_old, y_old, tt):
        y_mm = y_old.astype(jnp.bfloat16) if use_bf16_matmul else y_old
        ay = jnp.dot(A_mm, y_mm, preferred_element_type=jnp.float32)   # MXU hot path
        x_new = softshrink(ay + dty)
        y_new = x_new * (1.0 + tt) - x_old * tt                        # tt from SMEM schedule
        return x_new, y_new

    # --- iteration 0 peeled: x0 = y0 = 0 -> A@y = 0 (matmul skipped), tt_0 = 0.
    #     torch's divisor is M on this iteration (x_old.shape[1] while x_old is (K, M))
    #     and K afterwards — reproduced via the two precomputed squared thresholds.
    x1 = softshrink(dty)
    d0 = jnp.sum(x1 * x1)
    out_ref[...] = x1
    y_ref[...] = x1
    nc0 = (d0 >= thr0_sq).astype(jnp.int32)     # "not converged" flag

    n_chunks = (max_iter - 1) // unroll
    chunk_end = 1 + n_chunks * unroll

    # --- main loop: `unroll` FISTA steps per trip; convergence checked once per trip.
    # TODO(synk): with B*M tiled, the early-exit norm is per column tile, not torch's
    # single global Frobenius norm; identical whenever one tile covers the problem
    # (as in the demo shapes).
    def chunk_cond(c):
        it, nc = c
        return jnp.logical_and(it < chunk_end, nc > 0)

    def chunk_body(c):
        it, _ = c
        x = out_ref[...]
        y = y_ref[...]
        x_prev = x
        for s in range(unroll):
            x_prev = x
            x, y = step(x, y, scal_ref[it + (1 + s)])
        d_sq = jnp.sum((x - x_prev) ** 2)        # only the chunk's last step is checked
        out_ref[...] = x
        y_ref[...] = y
        return it + unroll, (d_sq >= thr_sq).astype(jnp.int32)

    it, nc = lax.while_loop(chunk_cond, chunk_body, (jnp.int32(1), nc0))

    # --- exact tail: remaining (max_iter-1) % unroll iterations, per-step check,
    #     runs only if the chunked loop exhausted its budget without converging.
    def tail_cond(c):
        it, nc = c
        return jnp.logical_and(it < max_iter, nc > 0)

    def tail_body(c):
        it, _ = c
        x_old = out_ref[...]
        x, y = step(x_old, y_ref[...], scal_ref[it + 1])
        d_sq = jnp.sum((x - x_old) ** 2)
        out_ref[...] = x
        y_ref[...] = y
        return it + 1, (d_sq >= thr_sq).astype(jnp.int32)

    _ = lax.while_loop(tail_cond, tail_body, (it, nc))


def fista_pallas(D, Y, lambd=0.1, max_iter=100, unroll=4,
                 tile_bm_max=2048, use_bf16_matmul=False):
    """D: (T, K) dictionary, Y: (B, T, M). Returns sparse codes (B, K, M)."""
    B, T, M = Y.shape
    K = D.shape[1]
    D = D.astype(jnp.float32)
    Y = Y.astype(jnp.float32)

    DtD = D.T @ D                                          # (K, K)
    # torch.norm(DtD, 2) with dim=None is the 2-norm of the *flattened* tensor
    # (i.e. the Frobenius norm) — reproduce that exactly.
    L = jnp.sqrt(jnp.sum(DtD * DtD))
    linv = 1.0 / L
    A = jnp.eye(K, dtype=jnp.float32) - DtD * linv         # (K, K)
    # Build DtY directly in K-major layout (no separate HBM transpose).
    dty = jnp.einsum("tk,btm->kbm", D, Y).reshape(K, B * M) * linv   # (K, B*M)

    # Data-independent momentum schedule tt_k = (t_k - 1) / t_{k+1}, t_0 = 1.
    tts = []
    t = 1.0
    for _ in range(max_iter):
        t_new = (1.0 + math.sqrt(1.0 + 4.0 * t * t)) / 2.0
        tts.append((t - 1.0) / t_new)
        t = t_new
    lam = jnp.float32(lambd) * linv
    scal = jnp.concatenate([lam[None], jnp.asarray(tts, jnp.float32)])   # (1 + max_iter,)

    # --- padding / tiling -------------------------------------------------------
    BM = B * M
    kmult = 16 if use_bf16_matmul else 8         # bf16 sublane packing wants %16
    K_pad = _round_up(K, kmult)
    bm128 = _round_up(BM, 128)
    TILE_BM = min(tile_bm_max, bm128)            # lane-dense, wide tile (sweep 1024..8192)
    # If a single tile would cover everything but the width splits cleanly, use 2 tiles
    # so v7x's two TensorCores both get work ("parallel" grid) with zero extra padding.
    if TILE_BM == bm128 and bm128 >= 256 and bm128 % 256 == 0:
        TILE_BM = bm128 // 2
    BM_pad = _round_up(BM, TILE_BM)
    n_tiles = BM_pad // TILE_BM

    # Zero padding is numerically inert: padded rows/cols of A and padded columns of
    # DtY keep the corresponding entries of x exactly zero (softshrink(0) == 0) and
    # contribute nothing to the convergence norm.
    A_p = jnp.zeros((K_pad, K_pad), jnp.float32).at[:K, :K].set(A)
    dty_p = jnp.zeros((K_pad, BM_pad), jnp.float32).at[:K, :BM].set(dty)

    thr0_sq = float((1e-4 * M) ** 2)   # iteration 0 divisor = M (torch quirk, see kernel)
    thr_sq = float((1e-4 * K) ** 2)    # subsequent divisor = K
    unroll = max(1, min(int(unroll), max(1, max_iter - 1)))

    kernel = functools.partial(_fista_kernel, max_iter=max_iter, unroll=unroll,
                               thr0_sq=thr0_sq, thr_sq=thr_sq,
                               use_bf16_matmul=use_bf16_matmul)

    x_p = pl.pallas_call(
        kernel,
        out_shape=jax.ShapeDtypeStruct((K_pad, BM_pad), jnp.float32),
        grid=(n_tiles,),
        in_specs=[
            pl.BlockSpec(memory_space=pltpu.MemorySpace.SMEM),       # [lam, tt schedule]
            pl.BlockSpec((K_pad, K_pad), lambda j: (0, 0)),          # A, resident
            pl.BlockSpec((K_pad, TILE_BM), lambda j: (0, j)),        # DtY column tile
        ],
        out_specs=pl.BlockSpec((K_pad, TILE_BM), lambda j: (0, j)),
        scratch_shapes=[pltpu.VMEM((K_pad, TILE_BM), jnp.float32)],  # momentum iterate y
        compiler_params=pltpu.CompilerParams(
            dimension_semantics=("parallel",)),                      # megacore on v7x
    )(scal, A_p, dty_p)

    x = x_p[:K, :BM]                                       # drop padding
    return x.reshape(K, B, M).transpose(1, 0, 2)           # (B, K, M)


class EncoderPallas:
    """Pallas equivalent of model/DyanOF.py::Encoder.forward."""

    def __init__(self, drr, dtheta, T):
        self.rr = drr          # nn.Parameter(Drr)
        self.theta = dtheta    # nn.Parameter(Dtheta)
        self.T = T

    def __call__(self, x):
        dic = create_real_dictionary(self.T, self.rr, self.theta)
        return fista_pallas(dic, x, 0.1, 100)


if __name__ == "__main__":
    key = jax.random.PRNGKey(0)
    k1, k2, k3 = jax.random.split(key, 3)

    N = 8          # number of pole pairs  -> K = 1 + 4*N = 33 dictionary atoms
    T = 8          # temporal length of the dictionary / input sequence
    B, M = 2, 16   # batch, pixels per frame

    # Deterministic synthetic parameters (same shapes as nn.Parameter(Drr/Dtheta)).
    drr = jax.random.uniform(k1, (N,), jnp.float32, minval=0.8, maxval=1.0)
    dtheta = jax.random.uniform(k2, (N,), jnp.float32, minval=0.0, maxval=math.pi)
    x = jax.random.normal(k3, (B, T, M), jnp.float32)

    enc = EncoderPallas(drr, dtheta, T)
    out = jax.block_until_ready(enc(x))

    assert out.shape == (B, 1 + 4 * N, M), out.shape
    assert bool(jnp.all(jnp.isfinite(out)))
    print("KERNEL_OK")
</pallas_src>

<mosaic_0001>
module attributes {stable_mosaic.version = 11 : i64} {
  func.func @_fista_kernel(%arg0: i32, %arg1: memref<101xf32, #tpu.memory_space<smem>>, %arg2: memref<40x40xf32, #tpu.memory_space<vmem>>, %arg3: memref<40x128xf32, #tpu.memory_space<vmem>>, %arg4: memref<40x128xf32, #tpu.memory_space<vmem>>, %arg5: memref<40x128xf32, #tpu.memory_space<vmem>>) attributes {dimension_semantics = [#tpu.dimension_semantics<parallel>], iteration_bounds = array<i64: 1>, scalar_prefetch = 0 : i64, scratch_operands = 1 : i64, tpu.core_type = #tpu.core_type<tc>, window_params = [{transform_indices = @transform_0, window_bounds = array<i64: 101>}, {pipeline_mode = #tpu.pipeline_mode<synchronous>, transform_indices = @transform_1, window_bounds = array<i64: 40, 40>}, {transform_indices = @transform_2, window_bounds = array<i64: 40, 128>}, {transform_indices = @transform_3, window_bounds = array<i64: 40, 128>}]} {
    %c0 = arith.constant 0 : index
    %c0_0 = arith.constant 0 : index
    %0 = vector.load %arg2[%c0, %c0_0] : memref<40x40xf32, #tpu.memory_space<vmem>>, vector<40x40xf32>
    %c0_1 = arith.constant 0 : index
    %c0_2 = arith.constant 0 : index
    %1 = vector.load %arg3[%c0_1, %c0_2] : memref<40x128xf32, #tpu.memory_space<vmem>>, vector<40x128xf32>
    %c0_3 = arith.constant 0 : index
    %2 = memref.load %arg1[%c0_3] : memref<101xf32, #tpu.memory_space<smem>>
    %cst = arith.constant 0.000000e+00 : f32
    %3 = arith.subf %cst, %2 : f32
    %4 = vector.broadcast %3 : f32 to vector<40x128xf32>
    %5 = arith.maximumf %4, %1 : vector<40x128xf32>
    %6 = vector.broadcast %2 : f32 to vector<40x128xf32>
    %7 = arith.minimumf %6, %5 : vector<40x128xf32>
    %8 = arith.subf %1, %7 : vector<40x128xf32>
    %9 = arith.mulf %8, %8 : vector<40x128xf32>
    %10 = vector.shape_cast %9 : vector<40x128xf32> to vector<1x40x128xf32>
    %cst_4 = arith.constant dense<0.000000e+00> : vector<1xf32>
    %11 = vector.multi_reduction <add>, %10, %cst_4 [1, 2] : vector<1x40x128xf32> to vector<1xf32>
    %12 = vector.shape_cast %11 : vector<1xf32> to vector<1x1x1xf32>
    %13 = vector.extract %12[0, 0, 0] : f32 from vector<1x1x1xf32>
    %c0_5 = arith.constant 0 : index
    %c0_6 = arith.constant 0 : index
    %14 = vector.load %arg4[%c0_5, %c0_6] : memref<40x128xf32, #tpu.memory_space<vmem>>, vector<40x128xf32>
    tpu.vector_store %arg4[%c0_5, %c0_6], %8 {strides = array<i32>} : memref<40x128xf32, #tpu.memory_space<vmem>>, vector<40x128xf32>,
    %c0_7 = arith.constant 0 : index
    %c0_8 = arith.constant 0 : index
    %15 = vector.load %arg5[%c0_7, %c0_8] : memref<40x128xf32, #tpu.memory_space<vmem>>, vector<40x128xf32>
    tpu.vector_store %arg5[%c0_7, %c0_8], %8 {strides = array<i32>} : memref<40x128xf32, #tpu.memory_space<vmem>>, vector<40x128xf32>,
    %cst_9 = arith.constant 2.560000e-06 : f32
    %16 = arith.cmpf oge, %13, %cst_9 : f32
    %17 = arith.extui %16 : i1 to i32
    %c1_i32 = arith.constant 1 : i32
    %18:2 = scf.while (%arg6 = %c1_i32, %arg7 = %17) : (i32, i32) -> (i32, i32) {
      %c97_i32 = arith.constant 97 : i32
      %20 = arith.cmpi slt, %arg6, %c97_i32 : i32
      %c0_i32 = arith.constant 0 : i32
      %21 = arith.cmpi sgt, %arg7, %c0_i32 : i32
      %22 = arith.andi %20, %21 : i1
      scf.condition(%22) %arg6, %arg7 : i32, i32
    } do {
    ^bb0(%arg6: i32, %arg7: i32):
      %c0_10 = arith.constant 0 : index
      %c0_11 = arith.constant 0 : index
      %20 = vector.load %arg4[%c0_10, %c0_11] : memref<40x128xf32, #tpu.memory_space<vmem>>, vector<40x128xf32>
      %c0_12 = arith.constant 0 : index
      %c0_13 = arith.constant 0 : index
      %21 = vector.load %arg5[%c0_12, %c0_13] : memref<40x128xf32, #tpu.memory_space<vmem>>, vector<40x128xf32>
      %c1_i32_14 = arith.constant 1 : i32
      %22 = arith.addi %arg6, %c1_i32_14 : i32
      %23 = arith.index_cast %22 : i32 to index
      %24 = memref.load %arg1[%23] : memref<101xf32, #tpu.memory_space<smem>>
      %cst_15 = arith.constant dense<0.000000e+00> : vector<40x128xf32>
      %25 = tpu.matmul %0, %21, %cst_15 {dimension_numbers = #tpu.dot_dimension_numbers<[1], [0], [0], [1], [0, 0, 1, 1], [], []>} : vector<40x40xf32>, vector<40x128xf32>, vector<40x128xf32> -> vector<40x128xf32>
      %26 = arith.addf %25, %1 : vector<40x128xf32>
      %cst_16 = arith.constant 0.000000e+00 : f32
      %27 = arith.subf %cst_16, %2 : f32
      %28 = vector.broadcast %27 : f32 to vector<40x128xf32>
      %29 = arith.maximumf %28, %26 : vector<40x128xf32>
      %30 = vector.broadcast %2 : f32 to vector<40x128xf32>
      %31 = arith.minimumf %30, %29 : vector<40x128xf32>
      %32 = arith.subf %26, %31 : vector<40x128xf32>
      %cst_17 = arith.constant 1.000000e+00 : f32
      %33 = arith.addf %cst_17, %24 : f32
      %34 = vector.broadcast %33 : f32 to vector<40x128xf32>
      %35 = arith.mulf %32, %34 : vector<40x128xf32>
      %36 = vector.broadcast %24 : f32 to vector<40x128xf32>
      %37 = arith.mulf %20, %36 : vector<40x128xf32>
      %38 = arith.subf %35, %37 : vector<40x128xf32>
      %c2_i32 = arith.constant 2 : i32
      %39 = arith.addi %arg6, %c2_i32 : i32
      %40 = arith.index_cast %39 : i32 to index
      %41 = memref.load %arg1[%40] : memref<101xf32, #tpu.memory_space<smem>>
      %cst_18 = arith.constant dense<0.000000e+00> : vector<40x128xf32>
      %42 = tpu.matmul %0, %38, %cst_18 {dimension_numbers = #tpu.dot_dimension_numbers<[1], [0], [0], [1], [0, 0, 1, 1], [], []>} : vector<40x40xf32>, vector<40x128xf32>, vector<40x128xf32> -> vector<40x128xf32>
      %43 = arith.addf %42, %1 : vector<40x128xf32>
      %cst_19 = arith.constant 0.000000e+00 : f32
      %44 = arith.subf %cst_19, %2 : f32
      %45 = vector.broadcast %44 : f32 to vector<40x128xf32>
      %46 = arith.maximumf %45, %43 : vector<40x128xf32>
      %47 = vector.broadcast %2 : f32 to vector<40x128xf32>
      %48 = arith.minimumf %47, %46 : vector<40x128xf32>
      %49 = arith.subf %43, %48 : vector<40x128xf32>
      %cst_20 = arith.constant 1.000000e+00 : f32
      %50 = arith.addf %cst_20, %41 : f32
      %51 = vector.broadcast %50 : f32 to vector<40x128xf32>
      %52 = arith.mulf %49, %51 : vector<40x128xf32>
      %53 = vector.broadcast %41 : f32 to vector<40x128xf32>
      %54 = arith.mulf %32, %53 : vector<40x128xf32>
      %55 = arith.subf %52, %54 : vector<40x128xf32>
      %c3_i32 = arith.constant 3 : i32
      %56 = arith.addi %arg6, %c3_i32 : i32
      %57 = arith.index_cast %56 : i32 to index
      %58 = memref.load %arg1[%57] : memref<101xf32, #tpu.memory_space<smem>>
      %cst_21 = arith.constant dense<0.000000e+00> : vector<40x128xf32>
      %59 = tpu.matmul %0, %55, %cst_21 {dimension_numbers = #tpu.dot_dimension_numbers<[1], [0], [0], [1], [0, 0, 1, 1], [], []>} : vector<40x40xf32>, vector<40x128xf32>, vector<40x128xf32> -> vector<40x128xf32>
      %60 = arith.addf %59, %1 : vector<40x128xf32>
      %cst_22 = arith.constant 0.000000e+00 : f32
      %61 = arith.subf %cst_22, %2 : f32
      %62 = vector.broadcast %61 : f32 to vector<40x128xf32>
      %63 = arith.maximumf %62, %60 : vector<40x128xf32>
      %64 = vector.broadcast %2 : f32 to vector<40x128xf32>
      %65 = arith.minimumf %64, %63 : vector<40x128xf32>
      %66 = arith.subf %60, %65 : vector<40x128xf32>
      %cst_23 = arith.constant 1.000000e+00 : f32
      %67 = arith.addf %cst_23, %58 : f32
      %68 = vector.broadcast %67 : f32 to vector<40x128xf32>
      %69 = arith.mulf %66, %68 : vector<40x128xf32>
      %70 = vector.broadcast %58 : f32 to vector<40x128xf32>
      %71 = arith.mulf %49, %70 : vector<40x128xf32>
      %72 = arith.subf %69, %71 : vector<40x128xf32>
      %c4_i32 = arith.constant 4 : i32
      %73 = arith.addi %arg6, %c4_i32 : i32
      %74 = arith.index_cast %73 : i32 to index
      %75 = memref.load %arg1[%74] : memref<101xf32, #tpu.memory_space<smem>>
      %cst_24 = arith.constant dense<0.000000e+00> : vector<40x128xf32>
      %76 = tpu.matmul %0, %72, %cst_24 {dimension_numbers = #tpu.dot_dimension_numbers<[1], [0], [0], [1], [0, 0, 1, 1], [], []>} : vector<40x40xf32>, vector<40x128xf32>, vector<40x128xf32> -> vector<40x128xf32>
      %77 = arith.addf %76, %1 : vector<40x128xf32>
      %cst_25 = arith.constant 0.000000e+00 : f32
      %78 = arith.subf %cst_25, %2 : f32
      %79 = vector.broadcast %78 : f32 to vector<40x128xf32>
      %80 = arith.maximumf %79, %77 : vector<40x128xf32>
      %81 = vector.broadcast %2 : f32 to vector<40x128xf32>
      %82 = arith.minimumf %81, %80 : vector<40x128xf32>
      %83 = arith.subf %77, %82 : vector<40x128xf32>
      %cst_26 = arith.constant 1.000000e+00 : f32
      %84 = arith.addf %cst_26, %75 : f32
      %85 = vector.broadcast %84 : f32 to vector<40x128xf32>
      %86 = arith.mulf %83, %85 : vector<40x128xf32>
      %87 = vector.broadcast %75 : f32 to vector<40x128xf32>
      %88 = arith.mulf %66, %87 : vector<40x128xf32>
      %89 = arith.subf %86, %88 : vector<40x128xf32>
      %90 = arith.subf %83, %66 : vector<40x128xf32>
      %91 = arith.mulf %90, %90 : vector<40x128xf32>
      %92 = vector.shape_cast %91 : vector<40x128xf32> to vector<1x40x128xf32>
      %cst_27 = arith.constant dense<0.000000e+00> : vector<1xf32>
      %93 = vector.multi_reduction <add>, %92, %cst_27 [1, 2] : vector<1x40x128xf32> to vector<1xf32>
      %94 = vector.shape_cast %93 : vector<1xf32> to vector<1x1x1xf32>
      %95 = vector.extract %94[0, 0, 0] : f32 from vector<1x1x1xf32>
      %c0_28 = arith.constant 0 : index
      %c0_29 = arith.constant 0 : index
      %96 = vector.load %arg4[%c0_28, %c0_29] : memref<40x128xf32, #tpu.memory_space<vmem>>, vector<40x128xf32>
      tpu.vector_store %arg4[%c0_28, %c0_29], %83 {strides = array<i32>} : memref<40x128xf32, #tpu.memory_space<vmem>>, vector<40x128xf32>,
      %c0_30 = arith.constant 0 : index
      %c0_31 = arith.constant 0 : index
      %97 = vector.load %arg5[%c0_30, %c0_31] : memref<40x128xf32, #tpu.memory_space<vmem>>, vector<40x128xf32>
      tpu.vector_store %arg5[%c0_30, %c0_31], %89 {strides = array<i32>} : memref<40x128xf32, #tpu.memory_space<vmem>>, vector<40x128xf32>,
      %c4_i32_32 = arith.constant 4 : i32
      %98 = arith.addi %arg6, %c4_i32_32 : i32
      %cst_33 = arith.constant 1.089000e-05 : f32
      %99 = arith.cmpf oge, %95, %cst_33 : f32
      %100 = arith.extui %99 : i1 to i32
      scf.yield %98, %100 : i32, i32
    }
    %19:2 = scf.while (%arg6 = %18#0, %arg7 = %18#1) : (i32, i32) -> (i32, i32) {
      %c100_i32 = arith.constant 100 : i32
      %20 = arith.cmpi slt, %arg6, %c100_i32 : i32
      %c0_i32 = arith.constant 0 : i32
      %21 = arith.cmpi sgt, %arg7, %c0_i32 : i32
      %22 = arith.andi %20, %21 : i1
      scf.condition(%22) %arg6, %arg7 : i32, i32
    } do {
    ^bb0(%arg6: i32, %arg7: i32):
      %c0_10 = arith.constant 0 : index
      %c0_11 = arith.constant 0 : index
      %20 = vector.load %arg4[%c0_10, %c0_11] : memref<40x128xf32, #tpu.memory_space<vmem>>, vector<40x128xf32>
      %c0_12 = arith.constant 0 : index
      %c0_13 = arith.constant 0 : index
      %21 = vector.load %arg5[%c0_12, %c0_13] : memref<40x128xf32, #tpu.memory_space<vmem>>, vector<40x128xf32>
      %c1_i32_14 = arith.constant 1 : i32
      %22 = arith.addi %arg6, %c1_i32_14 : i32
      %23 = arith.index_cast %22 : i32 to index
      %24 = memref.load %arg1[%23] : memref<101xf32, #tpu.memory_space<smem>>
      %cst_15 = arith.constant dense<0.000000e+00> : vector<40x128xf32>
      %25 = tpu.matmul %0, %21, %cst_15 {dimension_numbers = #tpu.dot_dimension_numbers<[1], [0], [0], [1], [0, 0, 1, 1], [], []>} : vector<40x40xf32>, vector<40x128xf32>, vector<40x128xf32> -> vector<40x128xf32>
      %26 = arith.addf %25, %1 : vector<40x128xf32>
      %cst_16 = arith.constant 0.000000e+00 : f32
      %27 = arith.subf %cst_16, %2 : f32
      %28 = vector.broadcast %27 : f32 to vector<40x128xf32>
      %29 = arith.maximumf %28, %26 : vector<40x128xf32>
      %30 = vector.broadcast %2 : f32 to vector<40x128xf32>
      %31 = arith.minimumf %30, %29 : vector<40x128xf32>
      %32 = arith.subf %26, %31 : vector<40x128xf32>
      %cst_17 = arith.constant 1.000000e+00 : f32
      %33 = arith.addf %cst_17, %24 : f32
      %34 = vector.broadcast %33 : f32 to vector<40x128xf32>
      %35 = arith.mulf %32, %34 : vector<40x128xf32>
      %36 = vector.broadcast %24 : f32 to vector<40x128xf32>
      %37 = arith.mulf %20, %36 : vector<40x128xf32>
      %38 = arith.subf %35, %37 : vector<40x128xf32>
      %39 = arith.subf %32, %20 : vector<40x128xf32>
      %40 = arith.mulf %39, %39 : vector<40x128xf32>
      %41 = vector.shape_cast %40 : vector<40x128xf32> to vector<1x40x128xf32>
      %cst_18 = arith.constant dense<0.000000e+00> : vector<1xf32>
      %42 = vector.multi_reduction <add>, %41, %cst_18 [1, 2] : vector<1x40x128xf32> to vector<1xf32>
      %43 = vector.shape_cast %42 : vector<1xf32> to vector<1x1x1xf32>
      %44 = vector.extract %43[0, 0, 0] : f32 from vector<1x1x1xf32>
      %c0_19 = arith.constant 0 : index
      %c0_20 = arith.constant 0 : index
      %45 = vector.load %arg4[%c0_19, %c0_20] : memref<40x128xf32, #tpu.memory_space<vmem>>, vector<40x128xf32>
      tpu.vector_store %arg4[%c0_19, %c0_20], %32 {strides = array<i32>} : memref<40x128xf32, #tpu.memory_space<vmem>>, vector<40x128xf32>,
      %c0_21 = arith.constant 0 : index
      %c0_22 = arith.constant 0 : index
      %46 = vector.load %arg5[%c0_21, %c0_22] : memref<40x128xf32, #tpu.memory_space<vmem>>, vector<40x128xf32>
      tpu.vector_store %arg5[%c0_21, %c0_22], %38 {strides = array<i32>} : memref<40x128xf32, #tpu.memory_space<vmem>>, vector<40x128xf32>,
      %c1_i32_23 = arith.constant 1 : i32
      %47 = arith.addi %arg6, %c1_i32_23 : i32
      %cst_24 = arith.constant 1.089000e-05 : f32
      %48 = arith.cmpf oge, %44, %cst_24 : f32
      %49 = arith.extui %48 : i1 to i32
      scf.yield %47, %49 : i32, i32
    }
    return
  }
  func.func @transform_0(%arg0: i32) -> i32 {
    %c0_i32 = arith.constant 0 : i32
    %c0_i32_0 = arith.constant 0 : i32
    return %c0_i32 : i32
  }
  func.func @transform_1(%arg0: i32) -> (i32, i32) {
    %c0_i32 = arith.constant 0 : i32
    %c0_i32_0 = arith.constant 0 : i32
    %c0_i32_1 = arith.constant 0 : i32
    return %c0_i32, %c0_i32_0 : i32, i32
  }
  func.func @transform_2(%arg0: i32) -> (i32, i32) {
    %c0_i32 = arith.constant 0 : i32
    %c0_i32_0 = arith.constant 0 : i32
    return %c0_i32, %arg0 : i32, i32
  }
  func.func @transform_3(%arg0: i32) -> (i32, i32) {
    %c0_i32 = arith.constant 0 : i32
    %c0_i32_0 = arith.constant 0 : i32
    return %c0_i32, %arg0 : i32, i32
  }
}

</mosaic_0001>

<bundles_post_ra>
// kernel: tpu_custom_call.1
= control target key start
LH: loop header
LB: loop body
LE: loop exit
PB: predicated region body
PF: predicated region fallthrough
CT: control target
= control target key end

     0   :  { %8 = vsyncpa [#allocation6], 0  ;;  %s1150_s0 = inlined_call_operand.hbm [shape: f32[101], index: 0, kind: input, shape index: {}]   ;;  %s1151_s1 = inlined_call_operand.hbm [shape: f32[40,40], index: 1, kind: input, shape index: {}]   ;;  %s1152_s2 = inlined_call_operand.hbm [shape: f32[40,128], index: 2, kind: input, shape index: {}]   ;;  %s1153_s3 = inlined_call_operand.hbm [shape: f32[40,128], index: 3, kind: output, shape index: {}]  }
   0x1   :  { %9 = vsyncpa [#allocation4], 0 }
   0x2   :  { %10 = vsyncpa [#allocation9], 0 }
   0x3   :  { %11 = vsyncpa [#allocation5], 0  ;;  %s17_s14 = sshll.u32 %s1150_s0, 4  ;;  %s25_s17 = sshll.u32 %s1151_s1, 4  ;;  %s18_s14 = int_to_ptr.hbm [resolvable:$true] %s17_s14  ;;  %s26_s17 = int_to_ptr.hbm [resolvable:$true] %s25_s17 }
   0x4   :  { %s842_s18 = smov [#allocation3]   ;;  %s843_s19 = smov [#allocation7]  }
   0x5   :  { %20 = dma.hbm_to_smem %s18_s14, 16, %s842_s18, [#allocation6]  }
   0x6   :  { %s27_s20 = sshll.u32 %s843_s19, 4  ;;  %s844_s21 = smov 128   ;;  %s28_s20 = int_to_ptr.vmem [resolvable:$true] %s27_s20 }
   0x7   :  { %s845_s22 = smov 8   ;;  %s38_s0 = sshll.u32 %s1152_s2, 4  ;;  %s39_s0 = int_to_ptr.hbm [resolvable:$true] %s38_s0 }
   0x8   :  { %33 = dma.hbm_to_vmem [thread:$0]  %s26_s17, 640, %s28_s20, [#allocation4], %s844_s21, %s844_s21, %s845_s22  }
   0x9   :  { %s846_s25 = smov [#allocation8]  }
   0xa   :  { %s40_s26 = sshll.u32 %s846_s25, 4  ;;  %s41_s26 = int_to_ptr.vmem [resolvable:$true] %s40_s26 }
   0xb   :  { %46 = dma.hbm_to_vmem [thread:$0]  %s39_s0, 640, %s41_s26, [#allocation9], %s844_s21, %s844_s21, %s845_s22  }
   0xc   :  { %818 = dma.done.wait [#allocation6], 16  }
   0xd   :  { %819 = vsyncadd [#allocation6], 4294967280 }
   0xe   :  { %820 = dma.done.wait [#allocation4], 640  }
   0xf   :  { %821 = vsyncadd [#allocation4], 4294966656 }
  0x10   :  { %822 = dma.done.wait [#allocation9], 640  }
  0x11   :  { %823 = vsyncadd [#allocation9], 4294966656 }
  0x12   :  { %59 = sfence }
  0x13   :  { %v883_v0 = vld [vmem:[#allocation7] sm:$0xff]  ;;  %v885_v1 = vld [vmem:[#allocation7 + $0x8] sm:$0xff]  ;;  %v887_v2 = vld [vmem:[#allocation7 + $0x10] sm:$0xff]  ;;  %s70_s1 = sld [smem:[#allocation3]]  ;;  %s929_s29 = smov 1  }
  0x14   :  { %v889_v3 = vld [vmem:[#allocation7 + $0x18] sm:$0xff]  ;;  %v891_v4 = vld [vmem:[#allocation7 + $0x20] sm:$0xff]  ;;  %v893_v5 = vld [vmem:[#allocation8] sm:$0xff] }
  0x15   :  { %v895_v6 = vld [vmem:[#allocation8 + $0x8] sm:$0xff]  ;;  %v897_v7 = vld [vmem:[#allocation8 + $0x10] sm:$0xff]  ;;  %v899_v8 = vld [vmem:[#allocation8 + $0x18] sm:$0xff] }
  0x16   :  { %v901_v9 = vld [vmem:[#allocation8 + $0x20] sm:$0xff] }
  0x19   :  { %s71_s2 = ssub.f32 0.0, %s70_s1  ;;  %v905_v11 = vstv %s70_s1 }
  0x1b   :  { %v903_v10 = vstv %s71_s2 }
  0x1c   :  { %v73_v12 = vmax.f32 %v903_v10, %v893_v5  ;;  %v74_v13 = vmax.f32 %v903_v10, %v895_v6  ;;  %v75_v14 = vmax.f32 %v903_v10, %v897_v7  ;;  %v76_v15 = vmax.f32 %v903_v10, %v899_v8 }
  0x1d   :  { %v77_v16 = vmax.f32 %v903_v10, %v901_v9 }
  0x1e   :  { %v79_v17 = vmin.f32 %v905_v11, %v73_v12  ;;  %v80_v18 = vmin.f32 %v905_v11, %v74_v13  ;;  %v81_v19 = vmin.f32 %v905_v11, %v75_v14  ;;  %v82_v20 = vmin.f32 %v905_v11, %v76_v15 }
  0x1f   :  { %v83_v21 = vmin.f32 %v905_v11, %v77_v16 }
  0x20   :  { %v84_v22 = vsub.f32 %v893_v5, %v79_v17  ;;  %v85_v23 = vsub.f32 %v895_v6, %v80_v18  ;;  %v86_v24 = vsub.f32 %v897_v7, %v81_v19  ;;  %v87_v25 = vsub.f32 %v899_v8, %v82_v20 }
  0x21   :  { %v88_v26 = vsub.f32 %v901_v9, %v83_v21 }
  0x22   :  { %v89_v27 = vmul.f32 %v84_v22, %v84_v22  ;;  %v90_v28 = vmul.f32 %v85_v23, %v85_v23  ;;  %v91_v29 = vmul.f32 %v86_v24, %v86_v24  ;;  %107 = vst [vmem:[#allocation10] sm:$0xff] %v84_v22  ;;  %v92_v30 = vmul.f32 %v87_v25, %v87_v25 }
  0x23   :  { %108 = vst [vmem:[#allocation10 + $0x8] sm:$0xff] %v85_v23  ;;  %v93_v32 = vmul.f32 %v88_v26, %v88_v26 }
  0x24   :  { %v94_v31 = vadd.f32 %v90_v28, %v89_v27  ;;  %109 = vst [vmem:[#allocation10 + $0x10] sm:$0xff] %v86_v24 }
  0x25   :  { %110 = vst [vmem:[#allocation10 + $0x18] sm:$0xff] %v87_v25 }
  0x26   :  { %v95_v33 = vadd.f32 %v94_v31, %v91_v29  ;;  %111 = vst [vmem:[#allocation10 + $0x20] sm:$0xff] %v88_v26 }
  0x27   :  { %112 = vst [vmem:[#allocation2 + $0x8] sm:$0xff] %v84_v22 }
  0x28   :  { %v96_v34 = vadd.f32 %v95_v33, %v92_v30  ;;  %113 = vst [vmem:[#allocation2] sm:$0xff] %v85_v23 }
  0x29   :  { %114 = vst [vmem:[#allocation2 + $0x20] sm:$0xff] %v86_v24 }
  0x2a   :  { %v97_v35 = vadd.f32 %v96_v34, %v93_v32  ;;  %115 = vst [vmem:[#allocation2 + $0x10] sm:$0xff] %v87_v25 }
  0x2b   :  { %116 = vst [vmem:[#allocation2 + $0x18] sm:$0xff] %v88_v26 }
  0x2c   :  { %98 = vadd.xlane.f32.xlu0 %v97_v35 }
  0x9f   :  { %v99_v36 = vpop.xlane.xlu0 %98 }
  0xa0   :  { %v100_v37 = vrot.slane %v99_v36, 4 }
  0xa2   :  { %v101_v38 = vadd.f32 %v100_v37, %v99_v36 }
  0xa4   :  { %v102_v39 = vrot.slane %v101_v38, 2 }
  0xa6   :  { %v103_v40 = vadd.f32 %v102_v39, %v101_v38 }
  0xa8   :  { %v104_v41 = vrot.slane %v103_v40, 1 }
  0xaa   :  { %v105_v42 = vadd.f32 %v104_v41, %v103_v40 }
  0xac   :  { %674 = vpush %v105_v42 }
  0xdd   :  { %s675_s27 = spop %674 }
  0xde   :  { %p117_p0 = scmp.ge.f32.partialorder %s675_s27, 2.56e-06 }
  0xdf   :  { %s931_s30 = smov (%p117_p0), 1  }
  0xe0   :  { %s118_s28 = scalar_select %p117_p0, 1, 0  }
  0xe1   :  { %620 = sbr.rel (!%p117_p0) target bundleno = 1149 (0x47d), region = 52 }
  0xe6 LB: > { %v137_v43 = vld [vmem:[#allocation2 + $0x18] sm:$0xff]  ;;  %v136_v44 = vld [vmem:[#allocation2 + $0x10] sm:$0xff]  ;;  %v135_v45 = vld [vmem:[#allocation2 + $0x20] sm:$0xff]  ;;  %vm140_vm0 = vcmask 326656   ;;  %s138_s4 = sadd.s32 1, %s828_s30  ;;  %s221_s7 = sadd.s32 2, %s828_s30  ;;  %s828_s30 = sphi %s931_s30, %s1155_s30  }
  0xe7   : > { %167 = vmatpush.msra.mxu0 %v137_v43  ;;  %v134_v46 = vld [vmem:[#allocation2] sm:$0xff]  ;;  %v133_v47 = vld [vmem:[#allocation2 + $0x8] sm:$0xff]  ;;  %s139_s5 = sld [smem:[#allocation3 + %s138_s4]]  ;;  %v132_v13 = vld [vmem:[#allocation10 + $0x20] sm:$0xff]  ;;  %s288_s10 = sadd.s32 3, %s828_s30 }
  0xe8   : > { %v131_v18 = vld [vmem:[#allocation10 + $0x18] sm:$0xff]  ;;  %v130_v24 = vld [vmem:[#allocation10 + $0x10] sm:$0xff]  ;;  %v129_v29 = vld [vmem:[#allocation10 + $0x8] sm:$0xff]  ;;  %s222_s8 = sld [smem:[#allocation3 + %s221_s7]]  ;;  %s1072_s30 = sadd.s32 4, %s828_s30  }
  0xe9   : > { %168 = vmatpush.msra.mxu0 %v136_v44  ;;  %v128_v34 = vld [vmem:[#allocation10] sm:$0xff]  ;;  %s289_s11 = sld [smem:[#allocation3 + %s288_s10]]  ;;  %s1154_s13 = smov %s1072_s30 }
  0xea   : > { %s356_s14 = sld [smem:[#allocation3 + %s1154_s13]]  ;;  %p122_p2 = scmp.lt.s32.totalorder %s1154_s13, 97 }
  0xeb   : > { %169 = vmatpush.msra.mxu0 %v135_v45  ;;  %s1155_s30 = smov %s1154_s13 }
  0xed   : > { %170 = vmatpush.msra.mxu0 %v134_v46  ;;  %s203_s6 = sadd.f32 1.0, %s139_s5  ;;  %v210_v17 = vstv %s139_s5 }
  0xee   : > { %v215_v22 = vmul.f32 %v210_v17, %v132_v13  ;;  %v214_v28 = vmul.f32 %v210_v17, %v131_v18  ;;  %v213_v33 = vmul.f32 %v210_v17, %v130_v24  ;;  %v212_v37 = vmul.f32 %v210_v17, %v129_v29  ;;  %s270_s9 = sadd.f32 1.0, %s222_s8 }
  0xef   : > { %171 = vmatpush.msra.mxu0 %v133_v47  ;;  %v204_v23 = vstv %s203_s6  ;;  %v211_v40 = vmul.f32 %v210_v17, %v128_v34  ;;  %s337_s12 = sadd.f32 1.0, %s289_s11 }
  0xf0   : > { %634 = vmatmul.msk.f32.vlgmr.msra.gmra.mxu0 %vm140_vm0, %v883_v0  ;;  %s404_s15 = sadd.f32 1.0, %s356_s14 }
  0xf8   : > { %635 = vmatmul.msk.f32.gmra.mxu0 %vm140_vm0, %v885_v1 }
 0x100   : > { %636 = vmatmul.msk.f32.gmra.mxu0 %vm140_vm0, %v887_v2 }
 0x108   : > { %637 = vmatmul.msk.f32.gmra.mxu0 %vm140_vm0, %v889_v3 }
 0x110   : > { %638 = vmatmul.msk.f32.gmra.mxu0 %vm140_vm0, %v891_v4 }
 0x16d   : > { %v173_v48 = vpop.f32.mrf.mxu0 }
 0x16e   : > { %v174_v56 = vadd.f32 %v173_v48, %v893_v5 }
 0x170   : > { %v188_v62 = vmax.f32 %v903_v10, %v174_v56 }
 0x172   : > { %v193_v19 = vmin.f32 %v905_v11, %v188_v62 }
 0x174   : > { %v969_v30 = vsub.f32 %v174_v56, %v193_v19 }
 0x175   : > { %v176_v49 = vpop.f32.mrf.mxu0 }
 0x176   : > { %v177_v54 = vadd.f32 %v176_v49, %v895_v6  ;;  %v205_v39 = vmul.f32 %v204_v23, %v969_v30 }
 0x178   : > { %v189_v59 = vmax.f32 %v903_v10, %v177_v54  ;;  %v216_v42 = vsub.f32 %v205_v39, %v211_v40 }
 0x17a   : > { %v194_v14 = vmin.f32 %v905_v11, %v189_v59 }
 0x17c   : > { %v966_v25 = vsub.f32 %v177_v54, %v194_v14  ;;  %v271_v14 = vstv %s270_s9 }
 0x17d   : > { %v179_v50 = vpop.f32.mrf.mxu0 }
 0x17e   : > { %v180_v53 = vadd.f32 %v179_v50, %v897_v7  ;;  %v206_v36 = vmul.f32 %v204_v23, %v966_v25 }
 0x180   : > { %v190_v57 = vmax.f32 %v903_v10, %v180_v53  ;;  %v217_v41 = vsub.f32 %v206_v36, %v212_v37 }
 0x182   : > { %v195_v63 = vmin.f32 %v905_v11, %v190_v57 }
 0x184   : > { %v964_v20 = vsub.f32 %v180_v53, %v195_v63 }
 0x185   : > { %v182_v51 = vpop.f32.mrf.mxu0 }
 0x186   : > { %v183_v52 = vadd.f32 %v182_v51, %v899_v8  ;;  %v207_v32 = vmul.f32 %v204_v23, %v964_v20 }
 0x188   : > { %v191_v55 = vmax.f32 %v903_v10, %v183_v52  ;;  %v218_v38 = vsub.f32 %v207_v32, %v213_v33 }
 0x18a   : > { %v196_v60 = vmin.f32 %v905_v11, %v191_v55 }
 0x18c   : > { %v960_v15 = vsub.f32 %v183_v52, %v196_v60 }
 0x18d   : > { %v185_v58 = vpop.f32.mrf.mxu0 }
 0x18e   : > { %v186_v61 = vadd.f32 %v185_v58, %v901_v9  ;;  %v208_v27 = vmul.f32 %v204_v23, %v960_v15 }
 0x190   : > { %v192_v12 = vmax.f32 %v903_v10, %v186_v61  ;;  %v219_v35 = vsub.f32 %v208_v27, %v214_v28 }
 0x192   : > { %v197_v16 = vmin.f32 %v905_v11, %v192_v12 }
 0x194   : > { %v202_v21 = vsub.f32 %v186_v61, %v197_v16  ;;  %v277_v16 = vstv %s222_s8 }
 0x195   : > { %v280_v29 = vmul.f32 %v277_v16, %v964_v20  ;;  %v279_v33 = vmul.f32 %v277_v16, %v966_v25 }
 0x196   : > { %v209_v26 = vmul.f32 %v204_v23, %v202_v21  ;;  %v282_v19 = vmul.f32 %v277_v16, %v202_v21 }
 0x198   : > { %v220_v31 = vsub.f32 %v209_v26, %v215_v22  ;;  %v281_v26 = vmul.f32 %v277_v16, %v960_v15 }
 0x19a   : > { %234 = vmatpush.msra.mxu1 %v220_v31 }
 0x19c   : > { %235 = vmatpush.msra.mxu1 %v219_v35  ;;  %v278_v35 = vmul.f32 %v277_v16, %v969_v30 }
 0x19e   : > { %236 = vmatpush.msra.mxu1 %v218_v38 }
 0x1a0   : > { %237 = vmatpush.msra.mxu1 %v217_v41 }
 0x1a2   : > { %238 = vmatpush.msra.mxu1 %v216_v42 }
 0x1a3   : > { %639 = vmatmul.msk.f32.vlgmr.msra.gmra.mxu1 %vm140_vm0, %v883_v0 }
 0x1ab   : > { %640 = vmatmul.msk.f32.gmra.mxu1 %vm140_vm0, %v885_v1 }
 0x1b3   : > { %641 = vmatmul.msk.f32.gmra.mxu1 %vm140_vm0, %v887_v2 }
 0x1bb   : > { %642 = vmatmul.msk.f32.gmra.mxu1 %vm140_vm0, %v889_v3 }
 0x1c3   : > { %643 = vmatmul.msk.f32.gmra.mxu1 %vm140_vm0, %v891_v4 }
 0x220   : > { %v240_v43 = vpop.f32.mrf.mxu1 }
 0x221   : > { %v241_v51 = vadd.f32 %v240_v43, %v893_v5 }
 0x223   : > { %v255_v57 = vmax.f32 %v903_v10, %v241_v51 }
 0x225   : > { %v260_v63 = vmin.f32 %v905_v11, %v255_v57  ;;  %v344_v57 = vstv %s289_s11 }
 0x227   : > { %v1007_v23 = vsub.f32 %v241_v51, %v260_v63 }
 0x228   : > { %v243_v44 = vpop.f32.mrf.mxu1 }
 0x229   : > { %v244_v49 = vadd.f32 %v243_v44, %v895_v6  ;;  %v272_v21 = vmul.f32 %v271_v14, %v1007_v23 }
 0x22b   : > { %v256_v54 = vmax.f32 %v903_v10, %v244_v49  ;;  %v283_v15 = vsub.f32 %v272_v21, %v278_v35 }
 0x22d   : > { %v261_v60 = vmin.f32 %v905_v11, %v256_v54 }
 0x22f   : > { %v1004_v17 = vsub.f32 %v244_v49, %v261_v60 }
 0x230   : > { %v246_v45 = vpop.f32.mrf.mxu1 }
 0x231   : > { %v247_v48 = vadd.f32 %v246_v45, %v897_v7  ;;  %v273_v31 = vmul.f32 %v271_v14, %v1004_v17 }
 0x233   : > { %v257_v52 = vmax.f32 %v903_v10, %v247_v48  ;;  %v284_v34 = vsub.f32 %v273_v31, %v279_v33  ;;  %v405_v33 = vstv %s404_s15 }
 0x235   : > { %v262_v58 = vmin.f32 %v905_v11, %v257_v52 }
 0x237   : > { %v1002_v12 = vsub.f32 %v247_v48, %v262_v58 }
 0x238   : > { %v249_v46 = vpop.f32.mrf.mxu1 }
 0x239   : > { %v250_v47 = vadd.f32 %v249_v46, %v899_v8  ;;  %v274_v27 = vmul.f32 %v271_v14, %v1002_v12 }
 0x23b   : > { %v258_v50 = vmax.f32 %v903_v10, %v250_v47  ;;  %v285_v32 = vsub.f32 %v274_v27, %v280_v29  ;;  %v345_v29 = vmul.f32 %v344_v57, %v1007_v23 }
 0x23d   : > { %v263_v55 = vmin.f32 %v905_v11, %v258_v50 }
 0x23f   : > { %v998_v61 = vsub.f32 %v250_v47, %v263_v55 }
 0x240   : > { %v252_v53 = vpop.f32.mrf.mxu1 }
 0x241   : > { %v253_v56 = vadd.f32 %v252_v53, %v901_v9  ;;  %v275_v22 = vmul.f32 %v271_v14, %v998_v61  ;;  %v348_v16 = vmul.f32 %v344_v57, %v998_v61 }
 0x243   : > { %v259_v59 = vmax.f32 %v903_v10, %v253_v56  ;;  %v286_v28 = vsub.f32 %v275_v22, %v281_v26  ;;  %v347_v22 = vmul.f32 %v344_v57, %v1002_v12 }
 0x245   : > { %v264_v62 = vmin.f32 %v905_v11, %v259_v59 }
 0x247   : > { %v269_v13 = vsub.f32 %v253_v56, %v264_v62  ;;  %v338_v56 = vstv %s337_s12 }
 0x249   : > { %v276_v18 = vmul.f32 %v271_v14, %v269_v13  ;;  %v349_v60 = vmul.f32 %v344_v57, %v269_v13  ;;  %v346_v13 = vmul.f32 %v344_v57, %v1004_v17 }
 0x24b   : > { %v287_v24 = vsub.f32 %v276_v18, %v282_v19 }
 0x24d   : > { %301 = vmatpush.msra.mxu2 %v287_v24 }
 0x24f   : > { %302 = vmatpush.msra.mxu2 %v286_v28 }
 0x251   : > { %303 = vmatpush.msra.mxu2 %v285_v32  ;;  %v411_v32 = vstv %s356_s14 }
 0x253   : > { %304 = vmatpush.msra.mxu2 %v284_v34 }
 0x255   : > { %305 = vmatpush.msra.mxu2 %v283_v15 }
 0x256   : > { %644 = vmatmul.msk.f32.vlgmr.msra.gmra.mxu2 %vm140_vm0, %v883_v0 }
 0x25e   : > { %645 = vmatmul.msk.f32.gmra.mxu2 %vm140_vm0, %v885_v1 }
 0x266   : > { %646 = vmatmul.msk.f32.gmra.mxu2 %vm140_vm0, %v887_v2 }
 0x26e   : > { %647 = vmatmul.msk.f32.gmra.mxu2 %vm140_vm0, %v889_v3 }
 0x276   : > { %648 = vmatmul.msk.f32.gmra.mxu2 %vm140_vm0, %v891_v4 }
 0x2d9   : > { %v307_v20 = vpop.f32.mrf.mxu2 }
 0x2da   : > { %v308_v41 = vadd.f32 %v307_v20, %v893_v5 }
 0x2dc   : > { %v322_v47 = vmax.f32 %v903_v10, %v308_v41 }
 0x2de   : > { %v327_v53 = vmin.f32 %v905_v11, %v322_v47 }
 0x2e0   : > { %v1052_v63 = vsub.f32 %v308_v41, %v327_v53 }
 0x2e1   : > { %v310_v25 = vpop.f32.mrf.mxu2 }
 0x2e2   : > { %v311_v39 = vadd.f32 %v310_v25, %v895_v6  ;;  %v339_v27 = vmul.f32 %v338_v56, %v1052_v63  ;;  %v412_v35 = vmul.f32 %v411_v32, %v1052_v63 }
 0x2e4   : > { %v323_v44 = vmax.f32 %v903_v10, %v311_v39  ;;  %v350_v61 = vsub.f32 %v339_v27, %v345_v29 }
 0x2e6   : > { %v328_v50 = vmin.f32 %v905_v11, %v323_v44 }
 0x2e8   : > { %v1048_v58 = vsub.f32 %v311_v39, %v328_v50 }
 0x2e9   : > { %v313_v30 = vpop.f32.mrf.mxu2 }
 0x2ea   : > { %v314_v38 = vadd.f32 %v313_v30, %v897_v7  ;;  %v340_v24 = vmul.f32 %v338_v56, %v1048_v58  ;;  %v413_v39 = vmul.f32 %v411_v32, %v1048_v58 }
 0x2ec   : > { %v324_v42 = vmax.f32 %v903_v10, %v314_v38  ;;  %v351_v28 = vsub.f32 %v340_v24, %v346_v13 }
 0x2ee   : > { %v329_v48 = vmin.f32 %v905_v11, %v324_v42 }
 0x2f0   : > { %v1044_v54 = vsub.f32 %v314_v38, %v329_v48 }
 0x2f1   : > { %v316_v36 = vpop.f32.mrf.mxu2 }
 0x2f2   : > { %v317_v37 = vadd.f32 %v316_v36, %v899_v8  ;;  %v341_v18 = vmul.f32 %v338_v56, %v1044_v54  ;;  %v414_v47 = vmul.f32 %v411_v32, %v1044_v54 }
 0x2f4   : > { %v325_v40 = vmax.f32 %v903_v10, %v317_v37  ;;  %v352_v26 = vsub.f32 %v341_v18, %v347_v22 }
 0x2f6   : > { %v330_v45 = vmin.f32 %v905_v11, %v325_v40 }
 0x2f8   : > { %v1040_v51 = vsub.f32 %v317_v37, %v330_v45 }
 0x2f9   : > { %v319_v43 = vpop.f32.mrf.mxu2 }
 0x2fa   : > { %v320_v46 = vadd.f32 %v319_v43, %v901_v9  ;;  %v342_v62 = vmul.f32 %v338_v56, %v1040_v51 }
 0x2fc   : > { %v326_v49 = vmax.f32 %v903_v10, %v320_v46  ;;  %v353_v19 = vsub.f32 %v342_v62, %v348_v16 }
 0x2fe   : > { %v331_v52 = vmin.f32 %v905_v11, %v326_v49 }
 0x300   : > { %v1046_v55 = vsub.f32 %v320_v46, %v331_v52 }
 0x302   : > { %v343_v59 = vmul.f32 %v338_v56, %v1046_v55 }
 0x304   : > { %v354_v14 = vsub.f32 %v343_v59, %v349_v60  ;;  %v415_v59 = vmul.f32 %v411_v32, %v1040_v51 }
 0x306   : > { %368 = vmatpush.msra.mxu3 %v354_v14 }
 0x308   : > { %369 = vmatpush.msra.mxu3 %v353_v19 }
 0x30a   : > { %370 = vmatpush.msra.mxu3 %v352_v26 }
 0x30c   : > { %371 = vmatpush.msra.mxu3 %v351_v28 }
 0x30e   : > { %372 = vmatpush.msra.mxu3 %v350_v61  ;;  %v416_v61 = vmul.f32 %v411_v32, %v1046_v55 }
 0x30f   : > { %649 = vmatmul.msk.f32.vlgmr.msra.gmra.mxu3 %vm140_vm0, %v883_v0 }
 0x317   : > { %650 = vmatmul.msk.f32.gmra.mxu3 %vm140_vm0, %v885_v1 }
 0x31f   : > { %651 = vmatmul.msk.f32.gmra.mxu3 %vm140_vm0, %v887_v2 }
 0x327   : > { %652 = vmatmul.msk.f32.gmra.mxu3 %vm140_vm0, %v889_v3 }
 0x32f   : > { %653 = vmatmul.msk.f32.gmra.mxu3 %vm140_vm0, %v891_v4 }
 0x392   : > { %v374_v12 = vpop.f32.mrf.mxu3 }
 0x393   : > { %v375_v17 = vadd.f32 %v374_v12, %v893_v5 }
 0x395   : > { %v389_v23 = vmax.f32 %v903_v10, %v375_v17 }
 0x397   : > { %v394_v31 = vmin.f32 %v905_v11, %v389_v23 }
 0x399   : > { %v399_v21 = vsub.f32 %v375_v17, %v394_v31 }
 0x39a   : > { %v377_v34 = vpop.f32.mrf.mxu3 }
 0x39b   : > { %v406_v15 = vmul.f32 %v405_v33, %v399_v21  ;;  %445 = vst [vmem:[#allocation10] sm:$0xff] %v399_v21  ;;  %v378_v20 = vadd.f32 %v377_v34, %v895_v6  ;;  %v422_v62 = vsub.f32 %v399_v21, %v1052_v63 }
 0x39d   : > { %v417_v25 = vsub.f32 %v406_v15, %v412_v35  ;;  %v390_v30 = vmax.f32 %v903_v10, %v378_v20  ;;  %v427_v13 = vmul.f32 %v422_v62, %v422_v62 }
 0x39f   : > { %450 = vst [vmem:[#allocation2 + $0x8] sm:$0xff] %v417_v25  ;;  %v395_v36 = vmin.f32 %v905_v11, %v390_v30 }
 0x3a1   : > { %v400_v37 = vsub.f32 %v378_v20, %v395_v36 }
 0x3a2   : > { %v380_v38 = vpop.f32.mrf.mxu3 }
 0x3a3   : > { %v407_v40 = vmul.f32 %v405_v33, %v400_v37  ;;  %446 = vst [vmem:[#allocation10 + $0x8] sm:$0xff] %v400_v37  ;;  %v381_v41 = vadd.f32 %v380_v38, %v897_v7  ;;  %v423_v56 = vsub.f32 %v400_v37, %v1048_v58 }
 0x3a5   : > { %v418_v42 = vsub.f32 %v407_v40, %v413_v39  ;;  %v391_v43 = vmax.f32 %v903_v10, %v381_v41  ;;  %v428_v19 = vmul.f32 %v423_v56, %v423_v56 }
 0x3a7   : > { %451 = vst [vmem:[#allocation2] sm:$0xff] %v418_v42  ;;  %v396_v44 = vmin.f32 %v905_v11, %v391_v43  ;;  %v432_v63 = vadd.f32 %v428_v19, %v427_v13 }
 0x3a9   : > { %v401_v45 = vsub.f32 %v381_v41, %v396_v44 }
 0x3aa   : > { %v383_v46 = vpop.f32.mrf.mxu3 }
 0x3ab   : > { %v408_v48 = vmul.f32 %v405_v33, %v401_v45  ;;  %447 = vst [vmem:[#allocation10 + $0x10] sm:$0xff] %v401_v45  ;;  %v384_v49 = vadd.f32 %v383_v46, %v899_v8  ;;  %v424_v18 = vsub.f32 %v401_v45, %v1044_v54 }
 0x3ad   : > { %v419_v50 = vsub.f32 %v408_v48, %v414_v47  ;;  %v392_v52 = vmax.f32 %v903_v10, %v384_v49  ;;  %v429_v27 = vmul.f32 %v424_v18, %v424_v18 }
 0x3af   : > { %452 = vst [vmem:[#allocation2 + $0x20] sm:$0xff] %v419_v50  ;;  %v397_v53 = vmin.f32 %v905_v11, %v392_v52  ;;  %v433_v17 = vadd.f32 %v432_v63, %v429_v27 }
 0x3b1   : > { %v402_v57 = vsub.f32 %v384_v49, %v397_v53 }
 0x3b2   : > { %v386_v60 = vpop.f32.mrf.mxu3 }
 0x3b3   : > { %v409_v14 = vmul.f32 %v405_v33, %v402_v57  ;;  %448 = vst [vmem:[#allocation10 + $0x18] sm:$0xff] %v402_v57  ;;  %v387_v16 = vadd.f32 %v386_v60, %v901_v9  ;;  %v425_v26 = vsub.f32 %v402_v57, %v1040_v51 }
 0x3b5   : > { %v420_v22 = vsub.f32 %v409_v14, %v415_v59  ;;  %v393_v24 = vmax.f32 %v903_v10, %v387_v16  ;;  %v430_v29 = vmul.f32 %v425_v26, %v425_v26 }
 0x3b7   : > { %453 = vst [vmem:[#allocation2 + $0x10] sm:$0xff] %v420_v22  ;;  %v398_v58 = vmin.f32 %v905_v11, %v393_v24  ;;  %v434_v21 = vadd.f32 %v433_v17, %v430_v29 }
 0x3b9   : > { %v403_v28 = vsub.f32 %v387_v16, %v398_v58 }
 0x3bb   : > { %v410_v12 = vmul.f32 %v405_v33, %v403_v28  ;;  %449 = vst [vmem:[#allocation10 + $0x20] sm:$0xff] %v403_v28  ;;  %v426_v54 = vsub.f32 %v403_v28, %v1046_v55 }
 0x3bd   : > { %v421_v23 = vsub.f32 %v410_v12, %v416_v61  ;;  %v431_v31 = vmul.f32 %v426_v54, %v426_v54 }
 0x3bf   : > { %454 = vst [vmem:[#allocation2 + $0x18] sm:$0xff] %v421_v23  ;;  %v435_v51 = vadd.f32 %v434_v21, %v431_v31 }
 0x3c1   : > { %436 = vadd.xlane.f32.xlu0 %v435_v51 }
 0x434   : > { %v437_v34 = vpop.xlane.xlu0 %436 }
 0x435   : > { %v438_v35 = vrot.slane %v437_v34, 4 }
 0x437   : > { %v439_v15 = vadd.f32 %v438_v35, %v437_v34 }
 0x439   : > { %v440_v20 = vrot.slane %v439_v15, 2 }
 0x43b   : > { %v441_v25 = vadd.f32 %v440_v20, %v439_v15 }
 0x43d   : > { %v442_v30 = vrot.slane %v441_v25, 1 }
 0x43f   : > { %v443_v36 = vadd.f32 %v442_v30, %v441_v25 }
 0x441   : > { %676 = vpush %v443_v36 }
 0x472   : > { %s677_s16 = spop %676 }
 0x473   : > { %p455_p1 = scmp.ge.f32.partialorder %s677_s16, 1.089e-05 }
 0x475   : > { %s456_s28 = scalar_select %p455_p1, 1, 0  }
 0x476   : > { %p124_p3 = pnand %p455_p1, %p122_p2 }
 0x477   :  { %s1156_s29 = smov (%p124_p3), %s1154_s13 }
 0x478   :  { %127 = sbr.rel (!%p124_p3) target bundleno = 230 (0xe6), region = 58 }
 0x47d PF:  { %p627_p4 = scmp.lt.s32.totalorder %s836_s29, 100  ;;  %p628_p5 = scmp.gt.s32.totalorder %s832_s28, 0  ;;  %s836_s29 = sphi %s929_s29, %s1156_s29   ;;  %s832_s28 = sphi %s118_s28, %s456_s28  }
 0x47f   :  { %p629_p6 = pnand %p628_p5, %p627_p4 }
 0x481   :  { %630 = sbr.rel (%p629_p6) target bundleno = 1509 (0x5e5), region = 63 }
 0x486 LB: > { %v475_v55 = vld [vmem:[#allocation2 + $0x18] sm:$0xff]  ;;  %v474_v32 = vld [vmem:[#allocation2 + $0x10] sm:$0xff]  ;;  %v473_v33 = vld [vmem:[#allocation2 + $0x20] sm:$0xff]  ;;  %vm478_vm1 = vcmask 326656   ;;  %s1122_s29 = sadd.s32 1, %s840_s29   ;;  %s840_s29 = sphi %s836_s29, %s1122_s29  }
 0x487   : > { %660 = vmatpush.msra.mxu2 %v475_v55  ;;  %661 = vmatpush.msra.mxu3 %v475_v55  ;;  %v472_v37 = vld [vmem:[#allocation2] sm:$0xff]  ;;  %v471_v38 = vld [vmem:[#allocation2 + $0x8] sm:$0xff]  ;;  %s477_s17 = sld [smem:[#allocation3 + %s1122_s29]]  ;;  %v466_v43 = vld [vmem:[#allocation10] sm:$0xff]  ;;  %p460_p8 = scmp.lt.s32.totalorder %s1122_s29, 100 }
 0x488   : > { %505 = vmatpush.msra.mxu0 %v475_v55  ;;  %659 = vmatpush.msra.mxu1 %v475_v55  ;;  %v467_v46 = vld [vmem:[#allocation10 + $0x8] sm:$0xff]  ;;  %v468_v13 = vld [vmem:[#allocation10 + $0x10] sm:$0xff]  ;;  %v469_v58 = vld [vmem:[#allocation10 + $0x18] sm:$0xff] }
 0x489   : > { %663 = vmatpush.msra.mxu2 %v474_v32  ;;  %664 = vmatpush.msra.mxu3 %v474_v32  ;;  %v470_v36 = vld [vmem:[#allocation10 + $0x20] sm:$0xff] }
 0x48a   : > { %506 = vmatpush.msra.mxu0 %v474_v32  ;;  %662 = vmatpush.msra.mxu1 %v474_v32 }
 0x48b   : > { %666 = vmatpush.msra.mxu2 %v473_v33  ;;  %667 = vmatpush.msra.mxu3 %v473_v33 }
 0x48c   : > { %507 = vmatpush.msra.mxu0 %v473_v33  ;;  %665 = vmatpush.msra.mxu1 %v473_v33 }
 0x48d   : > { %669 = vmatpush.msra.mxu2 %v472_v37  ;;  %670 = vmatpush.msra.mxu3 %v472_v37  ;;  %s541_s18 = sadd.f32 1.0, %s477_s17  ;;  %v548_v45 = vstv %s477_s17 }
 0x48e   : > { %508 = vmatpush.msra.mxu0 %v472_v37  ;;  %668 = vmatpush.msra.mxu1 %v472_v37  ;;  %v549_v59 = vmul.f32 %v548_v45, %v466_v43  ;;  %v550_v60 = vmul.f32 %v548_v45, %v467_v46  ;;  %v551_v17 = vmul.f32 %v548_v45, %v468_v13 }
 0x48f   : > { %672 = vmatpush.msra.mxu2 %v471_v38  ;;  %673 = vmatpush.msra.mxu3 %v471_v38  ;;  %v542_v57 = vstv %s541_s18  ;;  %v552_v21 = vmul.f32 %v548_v45, %v469_v58 }
 0x490   : > { %656 = vmatmul.msk.f32.vlgmr.msra.gmra.mxu2 %vm478_vm1, %v887_v2  ;;  %657 = vmatmul.msk.f32.vlgmr.msra.gmra.mxu3 %vm478_vm1, %v889_v3 }
 0x491   : > { %509 = vmatpush.msra.mxu0 %v471_v38  ;;  %671 = vmatpush.msra.mxu1 %v471_v38 }
 0x492   : > { %654 = vmatmul.msk.f32.vlgmr.msra.gmra.mxu0 %vm478_vm1, %v883_v0  ;;  %655 = vmatmul.msk.f32.vlgmr.msra.gmra.mxu1 %vm478_vm1, %v885_v1 }
 0x498   : > { %658 = vmatmul.msk.f32.gmra.mxu3 %vm478_vm1, %v891_v4 }
 0x50f   : > { %v511_v39 = vpop.f32.mrf.mxu0  ;;  %v514_v40 = vpop.f32.mrf.mxu1 }
 0x510   : > { %v512_v41 = vadd.f32 %v511_v39, %v893_v5  ;;  %v515_v42 = vadd.f32 %v514_v40, %v895_v6  ;;  %v553_v39 = vmul.f32 %v548_v45, %v470_v36 }
 0x512   : > { %v526_v44 = vmax.f32 %v903_v10, %v512_v41  ;;  %v527_v47 = vmax.f32 %v903_v10, %v515_v42 }
 0x513   : > { %v517_v48 = vpop.f32.mrf.mxu2  ;;  %v520_v49 = vpop.f32.mrf.mxu3 }
 0x514   : > { %v531_v50 = vmin.f32 %v905_v11, %v526_v44  ;;  %v532_v52 = vmin.f32 %v905_v11, %v527_v47  ;;  %v518_v53 = vadd.f32 %v517_v48, %v897_v7  ;;  %v521_v56 = vadd.f32 %v520_v49, %v899_v8 }
 0x516   : > { %v536_v62 = vsub.f32 %v512_v41, %v531_v50  ;;  %v537_v14 = vsub.f32 %v515_v42, %v532_v52  ;;  %v528_v16 = vmax.f32 %v903_v10, %v518_v53  ;;  %v529_v18 = vmax.f32 %v903_v10, %v521_v56 }
 0x518   : > { %v543_v19 = vmul.f32 %v542_v57, %v536_v62  ;;  %v559_v22 = vsub.f32 %v536_v62, %v466_v43  ;;  %582 = vst [vmem:[#allocation10] sm:$0xff] %v536_v62  ;;  %v544_v24 = vmul.f32 %v542_v57, %v537_v14  ;;  %v560_v26 = vsub.f32 %v537_v14, %v467_v46 }
 0x519   : > { %583 = vst [vmem:[#allocation10 + $0x8] sm:$0xff] %v537_v14  ;;  %v533_v27 = vmin.f32 %v905_v11, %v528_v16  ;;  %v534_v28 = vmin.f32 %v905_v11, %v529_v18 }
 0x51a   : > { %v554_v29 = vsub.f32 %v543_v19, %v549_v59  ;;  %v564_v63 = vmul.f32 %v559_v22, %v559_v22  ;;  %v555_v61 = vsub.f32 %v544_v24, %v550_v60  ;;  %v565_v12 = vmul.f32 %v560_v26, %v560_v26 }
 0x51b   : > { %v538_v54 = vsub.f32 %v518_v53, %v533_v27  ;;  %v539_v23 = vsub.f32 %v521_v56, %v534_v28  ;;  %v523_v31 = vpop.f32.mrf.mxu3 }
 0x51c   : > { %587 = vst [vmem:[#allocation2 + $0x8] sm:$0xff] %v554_v29  ;;  %v524_v51 = vadd.f32 %v523_v31, %v901_v9  ;;  %v569_v25 = vadd.f32 %v565_v12, %v564_v63 }
 0x51d   : > { %588 = vst [vmem:[#allocation2] sm:$0xff] %v555_v61  ;;  %v545_v34 = vmul.f32 %v542_v57, %v538_v54  ;;  %v561_v35 = vsub.f32 %v538_v54, %v468_v13  ;;  %v546_v15 = vmul.f32 %v542_v57, %v539_v23  ;;  %v562_v37 = vsub.f32 %v539_v23, %v469_v58 }
 0x51e   : > { %584 = vst [vmem:[#allocation10 + $0x10] sm:$0xff] %v538_v54  ;;  %v530_v20 = vmax.f32 %v903_v10, %v524_v51 }
 0x51f   : > { %v556_v30 = vsub.f32 %v545_v34, %v551_v17  ;;  %v557_v55 = vsub.f32 %v546_v15, %v552_v21  ;;  %v566_v32 = vmul.f32 %v561_v35, %v561_v35  ;;  %585 = vst [vmem:[#allocation10 + $0x18] sm:$0xff] %v539_v23  ;;  %v567_v43 = vmul.f32 %v562_v37, %v562_v37 }
 0x520   : > { %v535_v33 = vmin.f32 %v905_v11, %v530_v20 }
 0x521   : > { %589 = vst [vmem:[#allocation2 + $0x20] sm:$0xff] %v556_v30  ;;  %v570_v40 = vadd.f32 %v569_v25, %v566_v32 }
 0x522   : > { %v540_v38 = vsub.f32 %v524_v51, %v535_v33  ;;  %590 = vst [vmem:[#allocation2 + $0x10] sm:$0xff] %v557_v55 }
 0x523   : > { %v571_v47 = vadd.f32 %v570_v40, %v567_v43 }
 0x524   : > { %v547_v41 = vmul.f32 %v542_v57, %v540_v38  ;;  %v563_v42 = vsub.f32 %v540_v38, %v470_v36  ;;  %586 = vst [vmem:[#allocation10 + $0x20] sm:$0xff] %v540_v38 }
 0x526   : > { %v558_v44 = vsub.f32 %v547_v41, %v553_v39  ;;  %v568_v46 = vmul.f32 %v563_v42, %v563_v42 }
 0x528   : > { %v572_v48 = vadd.f32 %v571_v47, %v568_v46  ;;  %591 = vst [vmem:[#allocation2 + $0x18] sm:$0xff] %v558_v44 }
 0x52a   : > { %573 = vadd.xlane.f32.xlu0 %v572_v48 }
 0x59d   : > { %v574_v49 = vpop.xlane.xlu0 %573 }
 0x59e   : > { %v575_v50 = vrot.slane %v574_v49, 4 }
 0x5a0   : > { %v576_v52 = vadd.f32 %v575_v50, %v574_v49 }
 0x5a2   : > { %v577_v53 = vrot.slane %v576_v52, 2 }
 0x5a4   : > { %v578_v56 = vadd.f32 %v577_v53, %v576_v52 }
 0x5a6   : > { %v579_v59 = vrot.slane %v578_v56, 1 }
 0x5a8   : > { %v580_v60 = vadd.f32 %v579_v59, %v578_v56 }
 0x5aa   : > { %678 = vpush %v580_v60 }
 0x5db   : > { %s679_s19 = spop %678 }
 0x5dc   : > { %p592_p7 = scmp.ge.f32.partialorder %s679_s19, 1.089e-05 }
 0x5de   : > { %p462_p9 = pnand %p592_p7, %p460_p8 }
 0x5e0   :  { %465 = sbr.rel (!%p462_p9) target bundleno = 1158 (0x486), region = 69 }
 0x5e5 PF:  { %s600_s24 = sshll.u32 %s1153_s3, 4  ;;  %s847_s0 = smov [#allocation10]   ;;  %s601_s24 = int_to_ptr.hbm [resolvable:$true] %s600_s24 }
 0x5e6   :  { %s598_s25 = sshll.u32 %s847_s0, 4  ;;  %s599_s25 = int_to_ptr.vmem [resolvable:$true] %s598_s25 }
 0x5e7   :  { %606 = dma.vmem_to_hbm [thread:$0]  %s599_s25, 640, %s601_s24, [#allocation5], %s844_s21, %s844_s21, %s845_s22  }
 0x5e8   :  { %824 = dma.done.wait [#allocation5], 640  }
 0x5e9   :  { %825 = vsyncadd [#allocation5], 4294966656 }
 0x5ea   :  { %611 = vsyncpa [#allocation4], 1 }
 0x5eb   :  { %612 = vsyncpa [#allocation9], 1 }
 0x5ec   :  { %613 = vsyncpa [#allocation5], 1 }
 0x5ed   :  { %614 = vsyncpa [#allocation6], 1 }

</bundles_post_ra>
